<compile_context>
chip_gen: v7x
topology: tpu7x:2x2x1
jax: 0.10.0
libtpu: 0.0.40
codegen_flags: <defaults>
</compile_context>

<pallas_src>
import functools

import jax
import jax.numpy as jnp
import numpy as np
from jax.experimental import pallas as pl
from jax.experimental.pallas import tpu as pltpu

_EPS = 1e-6


def _round_up(a, b):
    return (a + b - 1) // b * b


def _logratio_kernel(xrow_ref, xT_ref, tgt_col_ref, labels_row_ref,
                     loss_part_ref, cnt_part_ref, *, kk, c_consts, n_actual):
    tm = xrow_ref.shape[0]
    n_cols = xT_ref.shape[1]

    # (TM, d) @ (d, n) on the MXU, f32 accumulation.
    sim = jnp.dot(xrow_ref[...], xT_ref[...], preferred_element_type=jnp.float32)

    # TODO(synk): like the PyTorch reference, log(sim + eps) is NaN for any
    # similarity <= -eps; semantics preserved (no clamp added).
    L = jnp.log(sim + _EPS)                               # (TM, n) f32 (EUP)
    # Row-centre: the loss only depends on L[j,k] - L[j,l]; centring keeps the
    # expanded quadratic form numerically tight in f32.
    L = L - jnp.mean(L, axis=1, keepdims=True)
    L2 = L * L                                            # hoisted out of m-loop

    tgt_col = tgt_col_ref[...]                            # (TM, 1) int32
    labels_row = labels_row_ref[...]                      # (kk, n) int32

    row0 = pl.program_id(0) * tm
    row_idx = row0 + jax.lax.broadcasted_iota(jnp.int32, (tm, n_cols), 0)
    col_idx = jax.lax.broadcasted_iota(jnp.int32, (tm, n_cols), 1)
    # j != k and j is a real (non-padded) query row.
    valid = jnp.logical_and(row_idx != col_idx, row_idx < n_actual)

    tgt_row = labels_row[0:1, :]                          # (1, n): targets[k]
    pos = jnp.logical_and(tgt_row == tgt_col, valid)      # (TM, n) bool

    zero = jnp.float32(0.0)
    # Positive-side row sums (shared by every hierarchy level m).
    P0 = jnp.sum(jnp.where(pos, 1.0, 0.0), axis=1, keepdims=True)
    SP1 = jnp.sum(jnp.where(pos, L, zero), axis=1, keepdims=True)
    SP2 = jnp.sum(jnp.where(pos, L2, zero), axis=1, keepdims=True)

    # Per-level equality masks, computed once (kk is tiny & static).
    eq = [labels_row[i:i + 1, :] == tgt_col for i in range(kk)]

    loss_acc = jnp.float32(0.0)
    cnt_acc = jnp.float32(0.0)
    for m in range(kk):                                   # unrolled (kk static)
        i = kk - 1 - m
        if m == 0:
            neg = jnp.logical_not(eq[kk - 1])
        else:
            # (~eq_i) ^ (~eq_{i+1})  ==  eq_i ^ eq_{i+1}
            neg = jnp.logical_xor(eq[i], eq[i + 1])

        N0 = jnp.sum(jnp.where(neg, 1.0, 0.0), axis=1, keepdims=True)
        N1 = jnp.sum(jnp.where(neg, L, zero), axis=1, keepdims=True)
        N2 = jnp.sum(jnp.where(neg, L2, zero), axis=1, keepdims=True)

        c = jnp.float32(c_consts[m])                      # 0.1 * loss_pair(m)
        PA1 = SP1 - c * P0
        PA2 = SP2 - 2.0 * c * SP1 + (c * c) * P0
        # sum_{k,l} pos[j,k] neg[j,l] ((L[j,k]-c) - L[j,l])^2, factored per row.
        loss_m = PA2 * N0 - 2.0 * PA1 * N1 + P0 * N2

        loss_acc = loss_acc + jnp.sum(loss_m)
        cnt_acc = cnt_acc + jnp.sum(P0 * N0)

    loss_part_ref[...] = jnp.broadcast_to(loss_acc, loss_part_ref.shape)
    cnt_part_ref[...] = jnp.broadcast_to(cnt_acc, cnt_part_ref.shape)


def log_ratio_loss(inputs, labels, Omega=0.1, *, block_rows=256,
                   matmul_dtype=jnp.bfloat16,
                   vmem_limit_bytes=48 * 1024 * 1024):
    """Pallas LogRatio.forward. Returns (loss, prec, mean_pos_sim, mean_neg_sim)."""
    inputs = jnp.asarray(inputs, jnp.float32)
    labels = jnp.asarray(labels, jnp.int32)
    n, d = inputs.shape
    kk = labels.shape[1]

    # Scalar constants 0.1 * loss_pair(m), baked at trace time (f32 math).
    omega32 = np.float32(Omega)
    eps32 = np.float32(_EPS)
    c_consts = tuple(
        float(np.float32(0.1) * (np.log(omega32 + eps32)
                                 - np.log(omega32 ** np.int32(kk - m + 1) + eps32)))
        for m in range(kk))

    # Query-row tile: multiple of 8 sublanes. Default 256 keeps the ~6 live
    # (TM, n) f32 slabs under ~24 MiB even at n=4096 (fits v7x's 64 MiB VMEM;
    # v5e/v6e have more headroom). Padded rows are masked out in-kernel.
    tm = min(_round_up(n, 8), _round_up(int(block_rows), 8))
    n_pad = _round_up(n, tm)
    num_tiles = n_pad // tm

    x_mm = inputs.astype(matmul_dtype)                    # bf16 MXU operands
    xT = x_mm.T                                           # (d, n), "k/l" side
    x_rows = x_mm
    tgt_col = labels[:, 0:1]                              # (n, 1)
    if n_pad != n:
        x_rows = jnp.pad(x_rows, ((0, n_pad - n), (0, 0)))
        tgt_col = jnp.pad(tgt_col, ((0, n_pad - n), (0, 0)))
    labels_row = labels.T                                 # (kk, n)

    part_shape = jax.ShapeDtypeStruct((num_tiles, 8, 128), jnp.float32)
    grid_spec = pltpu.PrefetchScalarGridSpec(
        num_scalar_prefetch=0,
        grid=(num_tiles,),
        in_specs=[
            pl.BlockSpec((tm, d), lambda i: (i, 0)),      # query-row tile of x
            pl.BlockSpec((d, n), lambda i: (0, 0)),       # full x^T, resident
            pl.BlockSpec((tm, 1), lambda i: (i, 0)),      # query-row targets
            pl.BlockSpec((kk, n), lambda i: (0, 0)),      # full labels^T, resident
        ],
        out_specs=(
            pl.BlockSpec((1, 8, 128), lambda i: (i, 0, 0)),
            pl.BlockSpec((1, 8, 128), lambda i: (i, 0, 0)),
        ),
    )

    loss_part, cnt_part = pl.pallas_call(
        functools.partial(_logratio_kernel, kk=kk, c_consts=c_consts, n_actual=n),
        out_shape=(part_shape, part_shape),
        grid_spec=grid_spec,
        compiler_params=pltpu.CompilerParams(
            dimension_semantics=("parallel",),            # shard tiles over TCs
            vmem_limit_bytes=vmem_limit_bytes),
    )(x_rows, xT, tgt_col, labels_row)

    loss_sum = jnp.sum(loss_part[:, 0, 0])
    cnt_sum = jnp.sum(cnt_part[:, 0, 0])
    loss = jnp.where(cnt_sum > 0.0, loss_sum / jnp.maximum(cnt_sum, 1.0),
                     jnp.float32(0.0))
    return loss, 0, jnp.float32(0.0), jnp.float32(0.0)


def _reference_logratio(x, labels, Omega=0.1):
    """Direct numpy port of the PyTorch quadruple loop (float64) for validation."""
    x = np.asarray(x, np.float64)
    labels = np.asarray(labels)
    n, kk = labels.shape
    sim = x @ x.T
    tgt = labels[:, 0]
    pos = (tgt[None, :] == tgt[:, None]) & ~np.eye(n, dtype=bool)
    neg, neg_raw = [], []
    for i in range(kk - 1, -1, -1):
        pos_inter = labels[:, i][None, :] == tgt[:, None]
        nm = ~pos_inter
        neg_raw.append(nm)
        if i == kk - 1:
            neg.append(nm)
        else:
            neg.append(nm ^ neg_raw[kk - i - 2])
    loss, cnt = 0.0, 0
    for j in range(n):
        for k in range(n):
            if pos[j, k]:
                for l in range(n):
                    for m in range(kk):
                        if neg[m][j, l]:
                            ld = np.log(sim[j, k] + _EPS) - np.log(sim[j, l] + _EPS)
                            lp = np.log(Omega + _EPS) - np.log(Omega ** (kk - m + 1) + _EPS)
                            loss += (ld - 0.1 * lp) ** 2
                            cnt += 1
    return loss / cnt if cnt > 0 else 0.0


if __name__ == "__main__":
    key = jax.random.PRNGKey(0)
    k_case1, k_case2 = jax.random.split(key)

    def make_inputs(n, d, k):
        kx, k0, k1, k2 = jax.random.split(k, 4)
        # Embedding-like inputs: positive, L2-normalized rows -> sim in (0, 1].
        x = jnp.abs(jax.random.normal(kx, (n, d), dtype=jnp.float32)) + 1e-3
        x = x / jnp.linalg.norm(x, axis=1, keepdims=True)
        labels = jnp.stack(
            [jax.random.randint(k0, (n,), 0, 4),
             jax.random.randint(k1, (n,), 0, 2),
             jax.random.randint(k2, (n,), 0, 2)], axis=1).astype(jnp.int32)
        return x, labels

    # Case 1: small batch, single tile.
    x, labels = make_inputs(8, 32, k_case1)

    # f32-matmul path validated tightly against the float64 reference.
    loss_f32, _, _, _ = log_ratio_loss(x, labels, Omega=0.1,
                                       matmul_dtype=jnp.float32)
    loss_f32 = jax.block_until_ready(loss_f32)
    ref = _reference_logratio(np.asarray(x), np.asarray(labels), Omega=0.1)
    np.testing.assert_allclose(float(loss_f32), ref, rtol=1e-3, atol=1e-5)

    # Default bf16-MXU path validated against a reference built from the same
    # bf16-rounded operands (so only the f32 accumulation differs).
    loss_bf16, _, _, _ = log_ratio_loss(x, labels, Omega=0.1)
    loss_bf16 = jax.block_until_ready(loss_bf16)
    x_q = np.asarray(x.astype(jnp.bfloat16).astype(jnp.float32))
    ref_q = _reference_logratio(x_q, np.asarray(labels), Omega=0.1)
    np.testing.assert_allclose(float(loss_bf16), ref_q, rtol=1e-3, atol=1e-4)

    # Case 2: exercises the multi-tile parallel grid and query-row padding
    # (n=20, block_rows=8 -> 3 tiles, 4 padded rows masked in-kernel).
    x2, labels2 = make_inputs(20, 32, k_case2)
    loss2, _, _, _ = log_ratio_loss(x2, labels2, Omega=0.1, block_rows=8,
                                    matmul_dtype=jnp.float32)
    loss2 = jax.block_until_ready(loss2)
    ref2 = _reference_logratio(np.asarray(x2), np.asarray(labels2), Omega=0.1)
    np.testing.assert_allclose(float(loss2), ref2, rtol=1e-3, atol=1e-5)

    print("KERNEL_OK")
</pallas_src>

<mosaic_0001>
module attributes {stable_mosaic.version = 11 : i64} {
  func.func @_logratio_kernel(%arg0: i32, %arg1: memref<8x32xf32, #tpu.memory_space<vmem>>, %arg2: memref<32x8xf32, #tpu.memory_space<vmem>>, %arg3: memref<8x1xi32, #tpu.memory_space<vmem>>, %arg4: memref<3x8xi32, #tpu.memory_space<vmem>>, %arg5: memref<1x8x128xf32, #tpu.memory_space<vmem>>, %arg6: memref<1x8x128xf32, #tpu.memory_space<vmem>>) attributes {dimension_semantics = [#tpu.dimension_semantics<parallel>], iteration_bounds = array<i64: 1>, scalar_prefetch = 0 : i64, scratch_operands = 0 : i64, tpu.core_type = #tpu.core_type<tc>, window_params = [{transform_indices = @transform_0, window_bounds = array<i64: 8, 32>}, {pipeline_mode = #tpu.pipeline_mode<synchronous>, transform_indices = @transform_1, window_bounds = array<i64: 32, 8>}, {transform_indices = @transform_2, window_bounds = array<i64: 8, 1>}, {pipeline_mode = #tpu.pipeline_mode<synchronous>, transform_indices = @transform_3, window_bounds = array<i64: 3, 8>}, {transform_indices = @transform_4, window_bounds = array<i64: 1, 8, 128>}, {transform_indices = @transform_5, window_bounds = array<i64: 1, 8, 128>}]} {
    %c0 = arith.constant 0 : index
    %c0_0 = arith.constant 0 : index
    %0 = vector.load %arg1[%c0, %c0_0] : memref<8x32xf32, #tpu.memory_space<vmem>>, vector<8x32xf32>
    %c0_1 = arith.constant 0 : index
    %c0_2 = arith.constant 0 : index
    %1 = vector.load %arg2[%c0_1, %c0_2] : memref<32x8xf32, #tpu.memory_space<vmem>>, vector<32x8xf32>
    %cst = arith.constant dense<0.000000e+00> : vector<8x8xf32>
    %2 = tpu.matmul %0, %1, %cst {dimension_numbers = #tpu.dot_dimension_numbers<[1], [0], [0], [1], [0, 0, 1, 1], [], []>} : vector<8x32xf32>, vector<32x8xf32>, vector<8x8xf32> -> vector<8x8xf32>
    %cst_3 = arith.constant 9.99999997E-7 : f32
    %3 = vector.broadcast %cst_3 : f32 to vector<8x8xf32>
    %4 = arith.addf %2, %3 : vector<8x8xf32>
    %5 = math.log %4 : vector<8x8xf32>
    %cst_4 = arith.constant dense<0.000000e+00> : vector<8xf32>
    %6 = vector.multi_reduction <add>, %5, %cst_4 [1] : vector<8x8xf32> to vector<8xf32>
    %7 = vector.shape_cast %6 : vector<8xf32> to vector<8x1xf32>
    %cst_5 = arith.constant 8.000000e+00 : f32
    %8 = vector.broadcast %cst_5 : f32 to vector<8x1xf32>
    %9 = arith.divf %7, %8 : vector<8x1xf32>
    %10 = vector.broadcast %9 : vector<8x1xf32> to vector<8x8xf32>
    %11 = arith.subf %5, %10 : vector<8x8xf32>
    %12 = arith.mulf %11, %11 : vector<8x8xf32>
    %c0_6 = arith.constant 0 : index
    %c0_7 = arith.constant 0 : index
    %13 = vector.load %arg3[%c0_6, %c0_7] : memref<8x1xi32, #tpu.memory_space<vmem>>, vector<8x1xi32>
    %c0_8 = arith.constant 0 : index
    %c0_9 = arith.constant 0 : index
    %14 = vector.load %arg4[%c0_8, %c0_9] : memref<3x8xi32, #tpu.memory_space<vmem>>, vector<3x8xi32>
    %c8_i32 = arith.constant 8 : i32
    %15 = arith.muli %arg0, %c8_i32 : i32
    %16 = tpu.iota {dimensions = array<i32: 0>} : vector<8x8xi32>
    %17 = vector.broadcast %15 : i32 to vector<8x8xi32>
    %18 = arith.addi %17, %16 : vector<8x8xi32>
    %19 = tpu.iota {dimensions = array<i32: 1>} : vector<8x8xi32>
    %20 = arith.cmpi ne, %18, %19 : vector<8x8xi32>
    %c8_i32_10 = arith.constant 8 : i32
    %21 = vector.broadcast %c8_i32_10 : i32 to vector<8x8xi32>
    %22 = arith.cmpi slt, %18, %21 : vector<8x8xi32>
    %23 = arith.andi %20, %22 : vector<8x8xi1>
    %24 = vector.extract_strided_slice %14 {offsets = [0, 0], sizes = [1, 8], strides = [1, 1]} : vector<3x8xi32> to vector<1x8xi32>
    %25 = vector.broadcast %24 : vector<1x8xi32> to vector<8x8xi32>
    %26 = vector.broadcast %13 : vector<8x1xi32> to vector<8x8xi32>
    %27 = arith.cmpi eq, %25, %26 : vector<8x8xi32>
    %28 = arith.andi %27, %23 : vector<8x8xi1>
    %cst_11 = arith.constant 1.000000e+00 : f32
    %cst_12 = arith.constant 0.000000e+00 : f32
    %29 = vector.broadcast %cst_11 : f32 to vector<8x8xf32>
    %30 = vector.broadcast %cst_12 : f32 to vector<8x8xf32>
    %31 = arith.select %28, %29, %30 : vector<8x8xi1>, vector<8x8xf32>
    %cst_13 = arith.constant dense<0.000000e+00> : vector<8xf32>
    %32 = vector.multi_reduction <add>, %31, %cst_13 [1] : vector<8x8xf32> to vector<8xf32>
    %33 = vector.shape_cast %32 : vector<8xf32> to vector<8x1xf32>
    %cst_14 = arith.constant 0.000000e+00 : f32
    %34 = vector.broadcast %cst_14 : f32 to vector<8x8xf32>
    %35 = arith.select %28, %11, %34 : vector<8x8xi1>, vector<8x8xf32>
    %cst_15 = arith.constant dense<0.000000e+00> : vector<8xf32>
    %36 = vector.multi_reduction <add>, %35, %cst_15 [1] : vector<8x8xf32> to vector<8xf32>
    %37 = vector.shape_cast %36 : vector<8xf32> to vector<8x1xf32>
    %cst_16 = arith.constant 0.000000e+00 : f32
    %38 = vector.broadcast %cst_16 : f32 to vector<8x8xf32>
    %39 = arith.select %28, %12, %38 : vector<8x8xi1>, vector<8x8xf32>
    %cst_17 = arith.constant dense<0.000000e+00> : vector<8xf32>
    %40 = vector.multi_reduction <add>, %39, %cst_17 [1] : vector<8x8xf32> to vector<8xf32>
    %41 = vector.shape_cast %40 : vector<8xf32> to vector<8x1xf32>
    %42 = vector.extract_strided_slice %14 {offsets = [0, 0], sizes = [1, 8], strides = [1, 1]} : vector<3x8xi32> to vector<1x8xi32>
    %43 = vector.broadcast %42 : vector<1x8xi32> to vector<8x8xi32>
    %44 = vector.broadcast %13 : vector<8x1xi32> to vector<8x8xi32>
    %45 = arith.cmpi eq, %43, %44 : vector<8x8xi32>
    %46 = vector.extract_strided_slice %14 {offsets = [1, 0], sizes = [1, 8], strides = [1, 1]} : vector<3x8xi32> to vector<1x8xi32>
    %47 = vector.broadcast %46 : vector<1x8xi32> to vector<8x8xi32>
    %48 = vector.broadcast %13 : vector<8x1xi32> to vector<8x8xi32>
    %49 = arith.cmpi eq, %47, %48 : vector<8x8xi32>
    %50 = vector.extract_strided_slice %14 {offsets = [2, 0], sizes = [1, 8], strides = [1, 1]} : vector<3x8xi32> to vector<1x8xi32>
    %51 = vector.broadcast %50 : vector<1x8xi32> to vector<8x8xi32>
    %52 = vector.broadcast %13 : vector<8x1xi32> to vector<8x8xi32>
    %53 = arith.cmpi eq, %51, %52 : vector<8x8xi32>
    %cst_18 = arith.constant dense<true> : vector<8x8xi1>
    %54 = arith.xori %53, %cst_18 : vector<8x8xi1>
    %cst_19 = arith.constant 1.000000e+00 : f32
    %cst_20 = arith.constant 0.000000e+00 : f32
    %55 = vector.broadcast %cst_19 : f32 to vector<8x8xf32>
    %56 = vector.broadcast %cst_20 : f32 to vector<8x8xf32>
    %57 = arith.select %54, %55, %56 : vector<8x8xi1>, vector<8x8xf32>
    %cst_21 = arith.constant dense<0.000000e+00> : vector<8xf32>
    %58 = vector.multi_reduction <add>, %57, %cst_21 [1] : vector<8x8xf32> to vector<8xf32>
    %59 = vector.shape_cast %58 : vector<8xf32> to vector<8x1xf32>
    %cst_22 = arith.constant 0.000000e+00 : f32
    %60 = vector.broadcast %cst_22 : f32 to vector<8x8xf32>
    %61 = arith.select %54, %11, %60 : vector<8x8xi1>, vector<8x8xf32>
    %cst_23 = arith.constant dense<0.000000e+00> : vector<8xf32>
    %62 = vector.multi_reduction <add>, %61, %cst_23 [1] : vector<8x8xf32> to vector<8xf32>
    %63 = vector.shape_cast %62 : vector<8xf32> to vector<8x1xf32>
    %cst_24 = arith.constant 0.000000e+00 : f32
    %64 = vector.broadcast %cst_24 : f32 to vector<8x8xf32>
    %65 = arith.select %54, %12, %64 : vector<8x8xi1>, vector<8x8xf32>
    %cst_25 = arith.constant dense<0.000000e+00> : vector<8xf32>
    %66 = vector.multi_reduction <add>, %65, %cst_25 [1] : vector<8x8xf32> to vector<8xf32>
    %67 = vector.shape_cast %66 : vector<8xf32> to vector<8x1xf32>
    %cst_26 = arith.constant 0.689781486 : f32
    %68 = vector.broadcast %cst_26 : f32 to vector<8x1xf32>
    %69 = arith.mulf %68, %33 : vector<8x1xf32>
    %70 = arith.subf %37, %69 : vector<8x1xf32>
    %cst_27 = arith.constant 2.000000e+00 : f32
    %cst_28 = arith.constant 0.689781486 : f32
    %71 = arith.mulf %cst_27, %cst_28 : f32
    %72 = vector.broadcast %71 : f32 to vector<8x1xf32>
    %73 = arith.mulf %72, %37 : vector<8x1xf32>
    %74 = arith.subf %41, %73 : vector<8x1xf32>
    %cst_29 = arith.constant 0.689781486 : f32
    %cst_30 = arith.constant 0.689781486 : f32
    %75 = arith.mulf %cst_29, %cst_30 : f32
    %76 = vector.broadcast %75 : f32 to vector<8x1xf32>
    %77 = arith.mulf %76, %33 : vector<8x1xf32>
    %78 = arith.addf %74, %77 : vector<8x1xf32>
    %79 = arith.mulf %78, %59 : vector<8x1xf32>
    %cst_31 = arith.constant 2.000000e+00 : f32
    %80 = vector.broadcast %cst_31 : f32 to vector<8x1xf32>
    %81 = arith.mulf %80, %70 : vector<8x1xf32>
    %82 = arith.mulf %81, %63 : vector<8x1xf32>
    %83 = arith.subf %79, %82 : vector<8x1xf32>
    %84 = arith.mulf %33, %67 : vector<8x1xf32>
    %85 = arith.addf %83, %84 : vector<8x1xf32>
    %86 = vector.shape_cast %85 : vector<8x1xf32> to vector<1x8x1xf32>
    %cst_32 = arith.constant dense<0.000000e+00> : vector<1xf32>
    %87 = vector.multi_reduction <add>, %86, %cst_32 [1, 2] : vector<1x8x1xf32> to vector<1xf32>
    %88 = vector.shape_cast %87 : vector<1xf32> to vector<1x1x1xf32>
    %89 = vector.extract %88[0, 0, 0] : f32 from vector<1x1x1xf32>
    %cst_33 = arith.constant 0.000000e+00 : f32
    %90 = arith.addf %cst_33, %89 : f32
    %91 = arith.mulf %33, %59 : vector<8x1xf32>
    %92 = vector.shape_cast %91 : vector<8x1xf32> to vector<1x8x1xf32>
    %cst_34 = arith.constant dense<0.000000e+00> : vector<1xf32>
    %93 = vector.multi_reduction <add>, %92, %cst_34 [1, 2] : vector<1x8x1xf32> to vector<1xf32>
    %94 = vector.shape_cast %93 : vector<1xf32> to vector<1x1x1xf32>
    %95 = vector.extract %94[0, 0, 0] : f32 from vector<1x1x1xf32>
    %cst_35 = arith.constant 0.000000e+00 : f32
    %96 = arith.addf %cst_35, %95 : f32
    %97 = arith.xori %49, %53 : vector<8x8xi1>
    %cst_36 = arith.constant 1.000000e+00 : f32
    %cst_37 = arith.constant 0.000000e+00 : f32
    %98 = vector.broadcast %cst_36 : f32 to vector<8x8xf32>
    %99 = vector.broadcast %cst_37 : f32 to vector<8x8xf32>
    %100 = arith.select %97, %98, %99 : vector<8x8xi1>, vector<8x8xf32>
    %cst_38 = arith.constant dense<0.000000e+00> : vector<8xf32>
    %101 = vector.multi_reduction <add>, %100, %cst_38 [1] : vector<8x8xf32> to vector<8xf32>
    %102 = vector.shape_cast %101 : vector<8xf32> to vector<8x1xf32>
    %cst_39 = arith.constant 0.000000e+00 : f32
    %103 = vector.broadcast %cst_39 : f32 to vector<8x8xf32>
    %104 = arith.select %97, %11, %103 : vector<8x8xi1>, vector<8x8xf32>
    %cst_40 = arith.constant dense<0.000000e+00> : vector<8xf32>
    %105 = vector.multi_reduction <add>, %104, %cst_40 [1] : vector<8x8xf32> to vector<8xf32>
    %106 = vector.shape_cast %105 : vector<8xf32> to vector<8x1xf32>
    %cst_41 = arith.constant 0.000000e+00 : f32
    %107 = vector.broadcast %cst_41 : f32 to vector<8x8xf32>
    %108 = arith.select %97, %12, %107 : vector<8x8xi1>, vector<8x8xf32>
    %cst_42 = arith.constant dense<0.000000e+00> : vector<8xf32>
    %109 = vector.multi_reduction <add>, %108, %cst_42 [1] : vector<8x8xf32> to vector<8xf32>
    %110 = vector.shape_cast %109 : vector<8xf32> to vector<8x1xf32>
    %cst_43 = arith.constant 0.460418075 : f32
    %111 = vector.broadcast %cst_43 : f32 to vector<8x1xf32>
    %112 = arith.mulf %111, %33 : vector<8x1xf32>
    %113 = arith.subf %37, %112 : vector<8x1xf32>
    %cst_44 = arith.constant 2.000000e+00 : f32
    %cst_45 = arith.constant 0.460418075 : f32
    %114 = arith.mulf %cst_44, %cst_45 : f32
    %115 = vector.broadcast %114 : f32 to vector<8x1xf32>
    %116 = arith.mulf %115, %37 : vector<8x1xf32>
    %117 = arith.subf %41, %116 : vector<8x1xf32>
    %cst_46 = arith.constant 0.460418075 : f32
    %cst_47 = arith.constant 0.460418075 : f32
    %118 = arith.mulf %cst_46, %cst_47 : f32
    %119 = vector.broadcast %118 : f32 to vector<8x1xf32>
    %120 = arith.mulf %119, %33 : vector<8x1xf32>
    %121 = arith.addf %117, %120 : vector<8x1xf32>
    %122 = arith.mulf %121, %102 : vector<8x1xf32>
    %cst_48 = arith.constant 2.000000e+00 : f32
    %123 = vector.broadcast %cst_48 : f32 to vector<8x1xf32>
    %124 = arith.mulf %123, %113 : vector<8x1xf32>
    %125 = arith.mulf %124, %106 : vector<8x1xf32>
    %126 = arith.subf %122, %125 : vector<8x1xf32>
    %127 = arith.mulf %33, %110 : vector<8x1xf32>
    %128 = arith.addf %126, %127 : vector<8x1xf32>
    %129 = vector.shape_cast %128 : vector<8x1xf32> to vector<1x8x1xf32>
    %cst_49 = arith.constant dense<0.000000e+00> : vector<1xf32>
    %130 = vector.multi_reduction <add>, %129, %cst_49 [1, 2] : vector<1x8x1xf32> to vector<1xf32>
    %131 = vector.shape_cast %130 : vector<1xf32> to vector<1x1x1xf32>
    %132 = vector.extract %131[0, 0, 0] : f32 from vector<1x1x1xf32>
    %133 = arith.addf %90, %132 : f32
    %134 = arith.mulf %33, %102 : vector<8x1xf32>
    %135 = vector.shape_cast %134 : vector<8x1xf32> to vector<1x8x1xf32>
    %cst_50 = arith.constant dense<0.000000e+00> : vector<1xf32>
    %136 = vector.multi_reduction <add>, %135, %cst_50 [1, 2] : vector<1x8x1xf32> to vector<1xf32>
    %137 = vector.shape_cast %136 : vector<1xf32> to vector<1x1x1xf32>
    %138 = vector.extract %137[0, 0, 0] : f32 from vector<1x1x1xf32>
    %139 = arith.addf %96, %138 : f32
    %140 = arith.xori %45, %49 : vector<8x8xi1>
    %cst_51 = arith.constant 1.000000e+00 : f32
    %cst_52 = arith.constant 0.000000e+00 : f32
    %141 = vector.broadcast %cst_51 : f32 to vector<8x8xf32>
    %142 = vector.broadcast %cst_52 : f32 to vector<8x8xf32>
    %143 = arith.select %140, %141, %142 : vector<8x8xi1>, vector<8x8xf32>
    %cst_53 = arith.constant dense<0.000000e+00> : vector<8xf32>
    %144 = vector.multi_reduction <add>, %143, %cst_53 [1] : vector<8x8xf32> to vector<8xf32>
    %145 = vector.shape_cast %144 : vector<8xf32> to vector<8x1xf32>
    %cst_54 = arith.constant 0.000000e+00 : f32
    %146 = vector.broadcast %cst_54 : f32 to vector<8x8xf32>
    %147 = arith.select %140, %11, %146 : vector<8x8xi1>, vector<8x8xf32>
    %cst_55 = arith.constant dense<0.000000e+00> : vector<8xf32>
    %148 = vector.multi_reduction <add>, %147, %cst_55 [1] : vector<8x8xf32> to vector<8xf32>
    %149 = vector.shape_cast %148 : vector<8xf32> to vector<8x1xf32>
    %cst_56 = arith.constant 0.000000e+00 : f32
    %150 = vector.broadcast %cst_56 : f32 to vector<8x8xf32>
    %151 = arith.select %140, %12, %150 : vector<8x8xi1>, vector<8x8xf32>
    %cst_57 = arith.constant dense<0.000000e+00> : vector<8xf32>
    %152 = vector.multi_reduction <add>, %151, %cst_57 [1] : vector<8x8xf32> to vector<8xf32>
    %153 = vector.shape_cast %152 : vector<8xf32> to vector<8x1xf32>
    %cst_58 = arith.constant 0.230249509 : f32
    %154 = vector.broadcast %cst_58 : f32 to vector<8x1xf32>
    %155 = arith.mulf %154, %33 : vector<8x1xf32>
    %156 = arith.subf %37, %155 : vector<8x1xf32>
    %cst_59 = arith.constant 2.000000e+00 : f32
    %cst_60 = arith.constant 0.230249509 : f32
    %157 = arith.mulf %cst_59, %cst_60 : f32
    %158 = vector.broadcast %157 : f32 to vector<8x1xf32>
    %159 = arith.mulf %158, %37 : vector<8x1xf32>
    %160 = arith.subf %41, %159 : vector<8x1xf32>
    %cst_61 = arith.constant 0.230249509 : f32
    %cst_62 = arith.constant 0.230249509 : f32
    %161 = arith.mulf %cst_61, %cst_62 : f32
    %162 = vector.broadcast %161 : f32 to vector<8x1xf32>
    %163 = arith.mulf %162, %33 : vector<8x1xf32>
    %164 = arith.addf %160, %163 : vector<8x1xf32>
    %165 = arith.mulf %164, %145 : vector<8x1xf32>
    %cst_63 = arith.constant 2.000000e+00 : f32
    %166 = vector.broadcast %cst_63 : f32 to vector<8x1xf32>
    %167 = arith.mulf %166, %156 : vector<8x1xf32>
    %168 = arith.mulf %167, %149 : vector<8x1xf32>
    %169 = arith.subf %165, %168 : vector<8x1xf32>
    %170 = arith.mulf %33, %153 : vector<8x1xf32>
    %171 = arith.addf %169, %170 : vector<8x1xf32>
    %172 = vector.shape_cast %171 : vector<8x1xf32> to vector<1x8x1xf32>
    %cst_64 = arith.constant dense<0.000000e+00> : vector<1xf32>
    %173 = vector.multi_reduction <add>, %172, %cst_64 [1, 2] : vector<1x8x1xf32> to vector<1xf32>
    %174 = vector.shape_cast %173 : vector<1xf32> to vector<1x1x1xf32>
    %175 = vector.extract %174[0, 0, 0] : f32 from vector<1x1x1xf32>
    %176 = arith.addf %133, %175 : f32
    %177 = arith.mulf %33, %145 : vector<8x1xf32>
    %178 = vector.shape_cast %177 : vector<8x1xf32> to vector<1x8x1xf32>
    %cst_65 = arith.constant dense<0.000000e+00> : vector<1xf32>
    %179 = vector.multi_reduction <add>, %178, %cst_65 [1, 2] : vector<1x8x1xf32> to vector<1xf32>
    %180 = vector.shape_cast %179 : vector<1xf32> to vector<1x1x1xf32>
    %181 = vector.extract %180[0, 0, 0] : f32 from vector<1x1x1xf32>
    %182 = arith.addf %139, %181 : f32
    %183 = vector.broadcast %176 : f32 to vector<1x8x128xf32>
    %c0_66 = arith.constant 0 : index
    %c0_67 = arith.constant 0 : index
    %c0_68 = arith.constant 0 : index
    %184 = vector.load %arg5[%c0_66, %c0_67, %c0_68] : memref<1x8x128xf32, #tpu.memory_space<vmem>>, vector<1x8x128xf32>
    tpu.vector_store %arg5[%c0_66, %c0_67, %c0_68], %183 {strides = array<i32>} : memref<1x8x128xf32, #tpu.memory_space<vmem>>, vector<1x8x128xf32>,
    %185 = vector.broadcast %182 : f32 to vector<1x8x128xf32>
    %c0_69 = arith.constant 0 : index
    %c0_70 = arith.constant 0 : index
    %c0_71 = arith.constant 0 : index
    %186 = vector.load %arg6[%c0_69, %c0_70, %c0_71] : memref<1x8x128xf32, #tpu.memory_space<vmem>>, vector<1x8x128xf32>
    tpu.vector_store %arg6[%c0_69, %c0_70, %c0_71], %185 {strides = array<i32>} : memref<1x8x128xf32, #tpu.memory_space<vmem>>, vector<1x8x128xf32>,
    return
  }
  func.func @transform_0(%arg0: i32) -> (i32, i32) {
    %c0_i32 = arith.constant 0 : i32
    %c0_i32_0 = arith.constant 0 : i32
    return %arg0, %c0_i32 : i32, i32
  }
  func.func @transform_1(%arg0: i32) -> (i32, i32) {
    %c0_i32 = arith.constant 0 : i32
    %c0_i32_0 = arith.constant 0 : i32
    %c0_i32_1 = arith.constant 0 : i32
    return %c0_i32, %c0_i32_0 : i32, i32
  }
  func.func @transform_2(%arg0: i32) -> (i32, i32) {
    %c0_i32 = arith.constant 0 : i32
    %c0_i32_0 = arith.constant 0 : i32
    return %arg0, %c0_i32 : i32, i32
  }
  func.func @transform_3(%arg0: i32) -> (i32, i32) {
    %c0_i32 = arith.constant 0 : i32
    %c0_i32_0 = arith.constant 0 : i32
    %c0_i32_1 = arith.constant 0 : i32
    return %c0_i32, %c0_i32_0 : i32, i32
  }
  func.func @transform_4(%arg0: i32) -> (i32, i32, i32) {
    %c0_i32 = arith.constant 0 : i32
    %c0_i32_0 = arith.constant 0 : i32
    %c0_i32_1 = arith.constant 0 : i32
    return %arg0, %c0_i32, %c0_i32_0 : i32, i32, i32
  }
  func.func @transform_5(%arg0: i32) -> (i32, i32, i32) {
    %c0_i32 = arith.constant 0 : i32
    %c0_i32_0 = arith.constant 0 : i32
    %c0_i32_1 = arith.constant 0 : i32
    return %arg0, %c0_i32, %c0_i32_0 : i32, i32, i32
  }
}

</mosaic_0001>

<bundles_post_ra>
// kernel: tpu_custom_call.1
= control target key start
LH: loop header
LB: loop body
LE: loop exit
PB: predicated region body
PF: predicated region fallthrough
CT: control target
= control target key end

     0   :  { %11 = vsyncpa [#allocation3], 0  ;;  %v423_v3 = vmov 0.0|0.0   ;;  %vm424_vm0 = vmmov 0   ;;  %v425_v6 = vmov 0.0   ;;  %s564_s0 = inlined_call_operand.vmem [shape: f32[8,32], index: 0, kind: input, shape index: {}]   ;;  %s565_s1 = inlined_call_operand.vmem [shape: f32[32,8], index: 1, kind: input, shape index: {}]   ;;  %s566_s2 = inlined_call_operand.vmem [shape: s32[8,1], index: 2, kind: input, shape index: {}]   ;;  %s567_s3 = inlined_call_operand.vmem [shape: s32[3,8], index: 3, kind: input, shape index: {}]   ;;  %s568_s4 = inlined_call_operand.hbm [shape: f32[1,8,128], index: 4, kind: output, shape index: {0}]   ;;  %s569_s5 = inlined_call_operand.hbm [shape: f32[1,8,128], index: 5, kind: output, shape index: {1}]  }
   0x1   :  { %v22_v0 = vld [vmem:[%s565_s1] sm:$0xff]  ;;  %v23_v1 = vld [vmem:[%s565_s1 + $0x8] sm:$0xff]  ;;  %v24_v2 = vld [vmem:[%s565_s1 + $0x10] sm:$0xff]  ;;  %347 = vmatprep.subr.bf16.mxu0 %v423_v3  ;;  %344 = vmatprep.mubr.msk.f32.mxu0 %vm424_vm0, %v425_v6 }
   0x2   :  { %v348_v4 = vpack.c.bf16 %v23_v1, %v22_v0  ;;  %v25_v5 = vld [vmem:[%s565_s1 + $0x18] sm:$0xff] }
   0x3   :  { %12 = vsyncpa [#allocation5], 0  ;;  %v351_v7 = vpack.c.bf16 %v25_v5, %v24_v2  ;;  %v21_v8 = vld [vmem:[%s564_s0] sm:$0xff]  ;;  %vm26_vm1 = vcmask 261120   ;;  %v426_v9 = vmov 0   ;;  %vm102_vm2 = vcmask 64512  }
   0x4   :  { %349 = vmatpush3.bf16.msra.mxu0 %v348_v4  ;;  %372 = vset.pattern.permute.xlu0 %v426_v9  ;;  %v110_v16 = vld [vmem:[%s566_s2] sm:$0xff]  ;;  %v113_v17 = vlaneseq  ;;  %vm427_vm8 = vmmov 1   ;;  %vm178_vm12 = vcmask 7168   ;;  %s428_s9 = smov [#allocation2]   ;;  %s429_s12 = smov [#allocation4]  }
   0x5   :  { %350 = vmatprep.subr.bf16.mxu0 %v423_v3  ;;  %v111_v21 = vld [vmem:[%s567_s3] sm:$0x7]  ;;  %s308_s10 = sshll.u32 %s428_s9, 4  ;;  %s318_s13 = sshll.u32 %s429_s12, 4  ;;  %s309_s10 = int_to_ptr.vmem [resolvable:$true] %s308_s10  ;;  %s319_s13 = int_to_ptr.vmem [resolvable:$true] %s318_s13 }
   0x6   :  { %v114_v18 = vshrl.u32 %v113_v17, 7  ;;  %v118_v23 = vand.u32 127, %v113_v17  ;;  %s375_s17 = scalar_lea.vmem %s309_s10, 128  ;;  %p380_p1 = scmp.lt.s32.totalorder %s309_s10, %s309_s10 }
   0x7   :  { %p376_p0 = scmp.ne.s32.totalorder %s309_s10, %s375_s17  ;;  %p381_p2 = scmp.lt.s32.totalorder %s375_s17, %s375_s17 }
   0x8   :  { %352 = vmatpush3.bf16.msra.mxu0 %v351_v7  ;;  %v124_v19 = vsub.s32 0, %v114_v18  ;;  %v150_v20 = vsub.s32 2, %v114_v18  ;;  %v145_v22 = vsub.s32 1, %v114_v18  ;;  %vm119_vm3 = vcmp.ne.s32.totalorder %v114_v18, %v118_v23 }
   0x9   :  { %p382_p3 = por %p381_p2, %p380_p1 }
   0xa   :  { %v125_v25 = vrot.slane %v111_v21, %v124_v19  ;;  %v151_v26 = vrot.slane %v111_v21, %v150_v20  ;;  %v146_v27 = vrot.slane %v111_v21, %v145_v22 }
   0xb   :  { %345 = vmatmul.mubr.msk.f32.vlgmr.msra.gmra.mrb[0].mxu0 %vm26_vm1, %v21_v8  ;;  %p383_p4 = pnand %p382_p3, %p376_p0 }
  0xde   :  { %v96_v10 = vpop.f32.mrb[0].mxu0 }
  0xdf   :  { %v97_v11 = vadd.f32 1e-06, %v96_v10  ;;  %v346_v12 = vpop.f32.mrb[1].mxu0 }
  0xe1   :  { %373 = vlog2.f32 %v97_v11 }
  0xeb   :  { %v374_v13 = vpop.eup %373 }
  0xec   :  { %v101_v14 = vmul.f32 0.6931472, %v374_v13 }
  0xee   :  { %v103_v15 = vsel %vm102_vm2, %v101_v14, 0.0 }
  0xef   :  { %104 = vadd.xlane.f32.xlu0 %v103_v15 }
 0x105   :  { %127 = vperm.xlu0 %372, %v110_v16  }
 0x17c   :  { %v105_v24 = vpop.xlane.xlu0 %104 }
 0x17d   :  { %v107_v38 = vmul.f32 0.125, %v105_v24 }
 0x17f   :  { %v108_v41 = vsub.f32 %v101_v14, %v107_v38 }
 0x181   :  { %v109_v50 = vmul.f32 %v108_v41, %v108_v41 }
 0x184   :  { %v128_v28 = vpop.permute.xlu0 %127 }
 0x185   :  { %vm129_vm4 = vcmp.eq.s32.totalorder %v125_v25, %v128_v28  ;;  %vm152_vm5 = vcmp.eq.s32.totalorder %v151_v26, %v128_v28  ;;  %vm147_vm7 = vcmp.eq.s32.totalorder %v146_v27, %v128_v28 }
 0x186   :  { %vm482_vm6 = vmand %vm129_vm4, %vm119_vm3 }
 0x187   :  { %v131_v30 = vsel %vm482_vm6, 1.0, %v425_v6  ;;  %vm488_vm9 = vmxor %vm152_vm5, %vm427_vm8  ;;  %v135_v43 = vsel %vm482_vm6, %v108_v41, 0.0  ;;  %v139_v52 = vsel %vm482_vm6, %v109_v50, 0.0 }
 0x188   :  { %v132_v32 = vsel %vm102_vm2, %v131_v30, 0.0  ;;  %v154_v33 = vsel %vm488_vm9, 1.0, %v425_v6  ;;  %vm495_vm10 = vmxor %vm147_vm7, %vm152_vm5  ;;  %v136_v44 = vsel %vm102_vm2, %v135_v43, 0.0  ;;  %v158_v45 = vsel %vm488_vm9, %v108_v41, 0.0 }
 0x189   :  { %133 = vadd.xlane.f32.xlu1 %v132_v32  ;;  %v155_v35 = vsel %vm102_vm2, %v154_v33, 0.0  ;;  %v203_v36 = vsel %vm495_vm10, 1.0, %v425_v6  ;;  %vm502_vm11 = vmxor %vm129_vm4, %vm147_vm7  ;;  %v159_v46 = vsel %vm102_vm2, %v158_v45, 0.0  ;;  %v207_v47 = vsel %vm495_vm10, %v108_v41, 0.0 }
 0x18a   :  { %v204_v39 = vsel %vm102_vm2, %v203_v36, 0.0  ;;  %v251_v40 = vsel %vm502_vm11, 1.0, %v425_v6  ;;  %v208_v48 = vsel %vm102_vm2, %v207_v47, 0.0  ;;  %v255_v49 = vsel %vm502_vm11, %v108_v41, 0.0 }
 0x18b   :  { %v252_v42 = vsel %vm102_vm2, %v251_v40, 0.0  ;;  %v256_v51 = vsel %vm102_vm2, %v255_v49, 0.0  ;;  %v140_v53 = vsel %vm102_vm2, %v139_v52, 0.0  ;;  %v162_v54 = vsel %vm488_vm9, %v109_v50, 0.0 }
 0x18c   :  { %v163_v55 = vsel %vm102_vm2, %v162_v54, 0.0  ;;  %v211_v56 = vsel %vm495_vm10, %v109_v50, 0.0  ;;  %v259_v58 = vsel %vm502_vm11, %v109_v50, 0.0 }
 0x18d   :  { %156 = vadd.xlane.f32.xlu1 %v155_v35  ;;  %v212_v57 = vsel %vm102_vm2, %v211_v56, 0.0  ;;  %v260_v59 = vsel %vm102_vm2, %v259_v58, 0.0 }
 0x191   :  { %205 = vadd.xlane.f32.xlu1 %v204_v39 }
 0x195   :  { %253 = vadd.xlane.f32.xlu1 %v252_v42 }
 0x199   :  { %137 = vadd.xlane.f32.xlu1 %v136_v44 }
 0x19d   :  { %160 = vadd.xlane.f32.xlu1 %v159_v46 }
 0x1a1   :  { %209 = vadd.xlane.f32.xlu1 %v208_v48 }
 0x1a5   :  { %257 = vadd.xlane.f32.xlu1 %v256_v51 }
 0x1a9   :  { %141 = vadd.xlane.f32.xlu1 %v140_v53 }
 0x1ad   :  { %164 = vadd.xlane.f32.xlu1 %v163_v55 }
 0x1b1   :  { %213 = vadd.xlane.f32.xlu1 %v212_v57 }
 0x1b5   :  { %261 = vadd.xlane.f32.xlu1 %v260_v59 }
 0x216   :  { %v134_v60 = vpop.xlane.xlu1 %133 }
 0x217   :  { %v166_v7 = vmul.f32 0.6897815, %v134_v60  ;;  %v215_v10 = vmul.f32 0.46041808, %v134_v60  ;;  %v170_v15 = vmul.f32 0.4757985, %v134_v60 }
 0x218   :  { %v219_v16 = vmul.f32 0.2119848, %v134_v60  ;;  %v263_v22 = vmul.f32 0.23024951, %v134_v60  ;;  %v267_v23 = vmul.f32 0.053014837, %v134_v60 }
 0x21a   :  { %v157_v61 = vpop.xlane.xlu1 %156 }
 0x21b   :  { %v190_v62 = vmul.f32 %v157_v61, %v134_v60 }
 0x21d   :  { %v191_v63 = vsel %vm178_vm12, %v190_v62, 0.0 }
 0x21e   :  { %192 = vadd.xlane.f32.xlu1 %v191_v63  ;;  %v206_v0 = vpop.xlane.xlu1 %205 }
 0x21f   :  { %v238_v1 = vmul.f32 %v206_v0, %v134_v60 }
 0x221   :  { %v239_v2 = vsel %vm178_vm12, %v238_v1, 0.0 }
 0x222   :  { %240 = vadd.xlane.f32.xlu1 %v239_v2  ;;  %v254_v3 = vpop.xlane.xlu1 %253 }
 0x223   :  { %v286_v50 = vmul.f32 %v254_v3, %v134_v60 }
 0x225   :  { %v287_v52 = vsel %vm178_vm12, %v286_v50, 0.0 }
 0x226   :  { %v138_v4 = vpop.xlane.xlu1 %137 }
 0x227   :  { %v167_v9 = vsub.f32 %v138_v4, %v166_v7  ;;  %v168_v11 = vmul.f32 1.379563, %v138_v4  ;;  %v217_v12 = vmul.f32 0.92083615, %v138_v4  ;;  %v265_v13 = vmul.f32 0.46049902, %v138_v4 }
 0x228   :  { %v216_v14 = vsub.f32 %v138_v4, %v215_v10  ;;  %v264_v27 = vsub.f32 %v138_v4, %v263_v22 }
 0x229   :  { %v173_v18 = vmul.f32 2.0, %v167_v9 }
 0x22a   :  { %v161_v5 = vpop.xlane.xlu1 %160  ;;  %v222_v26 = vmul.f32 2.0, %v216_v14  ;;  %v270_v36 = vmul.f32 2.0, %v264_v27 }
 0x22b   :  { %v174_v29 = vmul.f32 %v173_v18, %v161_v5 }
 0x22e   :  { %v210_v6 = vpop.xlane.xlu1 %209 }
 0x22f   :  { %v223_v33 = vmul.f32 %v222_v26, %v210_v6 }
 0x232   :  { %v258_v8 = vpop.xlane.xlu1 %257 }
 0x233   :  { %v271_v42 = vmul.f32 %v270_v36, %v258_v8 }
 0x236   :  { %v142_v17 = vpop.xlane.xlu1 %141 }
 0x237   :  { %v169_v19 = vsub.f32 %v142_v17, %v168_v11  ;;  %v218_v20 = vsub.f32 %v142_v17, %v217_v12  ;;  %v266_v21 = vsub.f32 %v142_v17, %v265_v13 }
 0x239   :  { %v171_v24 = vadd.f32 %v170_v15, %v169_v19  ;;  %v220_v25 = vadd.f32 %v219_v16, %v218_v20  ;;  %v268_v30 = vadd.f32 %v267_v23, %v266_v21 }
 0x23a   :  { %v165_v28 = vpop.xlane.xlu1 %164 }
 0x23b   :  { %v172_v31 = vmul.f32 %v171_v24, %v157_v61  ;;  %v221_v32 = vmul.f32 %v220_v25, %v206_v0  ;;  %v176_v34 = vmul.f32 %v165_v28, %v134_v60  ;;  %v269_v41 = vmul.f32 %v268_v30, %v254_v3 }
 0x23d   :  { %v175_v35 = vsub.f32 %v172_v31, %v174_v29  ;;  %v224_v40 = vsub.f32 %v221_v32, %v223_v33  ;;  %v272_v48 = vsub.f32 %v269_v41, %v271_v42 }
 0x23e   :  { %v214_v37 = vpop.xlane.xlu1 %213 }
 0x23f   :  { %v225_v38 = vmul.f32 %v214_v37, %v134_v60  ;;  %v177_v39 = vadd.f32 %v176_v34, %v175_v35 }
 0x241   :  { %v179_v43 = vsel %vm178_vm12, %v177_v39, 0.0  ;;  %v226_v44 = vadd.f32 %v225_v38, %v224_v40 }
 0x242   :  { %180 = vadd.xlane.f32.xlu0 %v179_v43  ;;  %v262_v45 = vpop.xlane.xlu1 %261 }
 0x243   :  { %v273_v46 = vmul.f32 %v262_v45, %v134_v60  ;;  %v227_v47 = vsel %vm178_vm12, %v226_v44, 0.0 }
 0x244   :  { %228 = vadd.xlane.f32.xlu1 %v227_v47 }
 0x245   :  { %v274_v49 = vadd.f32 %v273_v46, %v272_v48 }
 0x247   :  { %v275_v51 = vsel %vm178_vm12, %v274_v49, 0.0 }
 0x248   :  { %276 = vadd.xlane.f32.xlu1 %v275_v51 }
 0x24c   :  { %288 = vadd.xlane.f32.xlu1 %v287_v52 }
 0x2ab   :  { %v193_v53 = vpop.xlane.xlu1 %192 }
 0x2ac   :  { %v194_v55 = vrot.slane %v193_v53, 4 }
 0x2ae   :  { %v195_v57 = vadd.f32 %v194_v55, %v193_v53 }
 0x2af   :  { %v241_v54 = vpop.xlane.xlu1 %240 }
 0x2b0   :  { %v242_v56 = vrot.slane %v241_v54, 4  ;;  %v196_v59 = vrot.slane %v195_v57, 2 }
 0x2b2   :  { %v243_v58 = vadd.f32 %v242_v56, %v241_v54  ;;  %v197_v60 = vadd.f32 %v196_v59, %v195_v57 }
 0x2b4   :  { %v244_v63 = vrot.slane %v243_v58, 2  ;;  %v198_v10 = vrot.slane %v197_v60, 1 }
 0x2b6   :  { %v245_v6 = vadd.f32 %v244_v63, %v243_v58  ;;  %v199_v20 = vadd.f32 %v198_v10, %v197_v60 }
 0x2b8   :  { %v246_v15 = vrot.slane %v245_v6, 1 }
 0x2ba   :  { %v247_v24 = vadd.f32 %v246_v15, %v245_v6 }
 0x2cf   :  { %v181_v61 = vpop.xlane.xlu0 %180 }
 0x2d0   :  { %v182_v62 = vrot.slane %v181_v61, 4 }
 0x2d1   :  { %v229_v0 = vpop.xlane.xlu1 %228 }
 0x2d2   :  { %v183_v1 = vadd.f32 %v182_v62, %v181_v61  ;;  %v230_v2 = vrot.slane %v229_v0, 4 }
 0x2d4   :  { %v184_v3 = vrot.slane %v183_v1, 2  ;;  %v231_v4 = vadd.f32 %v230_v2, %v229_v0 }
 0x2d5   :  { %v277_v5 = vpop.xlane.xlu1 %276 }
 0x2d6   :  { %v232_v7 = vrot.slane %v231_v4, 2  ;;  %v278_v8 = vrot.slane %v277_v5, 4  ;;  %v185_v9 = vadd.f32 %v184_v3, %v183_v1 }
 0x2d8   :  { %v279_v11 = vadd.f32 %v278_v8, %v277_v5  ;;  %v186_v12 = vrot.slane %v185_v9, 1  ;;  %v233_v13 = vadd.f32 %v232_v7, %v231_v4 }
 0x2d9   :  { %v289_v14 = vpop.xlane.xlu1 %288 }
 0x2da   :  { %v280_v16 = vrot.slane %v279_v11, 2  ;;  %v290_v17 = vrot.slane %v289_v14, 4  ;;  %v187_v18 = vadd.f32 %v186_v12, %v185_v9  ;;  %v234_v19 = vrot.slane %v233_v13, 1 }
 0x2dc   :  { %v291_v21 = vadd.f32 %v290_v17, %v289_v14  ;;  %353 = vpush %v187_v18  ;;  %v235_v22 = vadd.f32 %v234_v19, %v233_v13  ;;  %v281_v23 = vadd.f32 %v280_v16, %v279_v11 }
 0x2dd   :  { %355 = vpush %v199_v20 }
 0x2de   :  { %v292_v25 = vrot.slane %v291_v21, 2  ;;  %357 = vpush %v235_v22  ;;  %v282_v26 = vrot.slane %v281_v23, 1 }
 0x2df   :  { %359 = vpush %v247_v24 }
 0x2e0   :  { %v293_v27 = vadd.f32 %v292_v25, %v291_v21  ;;  %v283_v28 = vadd.f32 %v282_v26, %v281_v23 }
 0x2e2   :  { %361 = vpush %v283_v28  ;;  %v294_v29 = vrot.slane %v293_v27, 1 }
 0x2e4   :  { %v295_v30 = vadd.f32 %v294_v29, %v293_v27 }
 0x2e6   :  { %363 = vpush %v295_v30 }
 0x30d   :  { %s354_s2 = spop %353 }
 0x30e   :  { %s356_s3 = spop %355 }
 0x30f   :  { %s358_s30 = spop %357 }
 0x310   :  { %s237_s6 = sadd.f32 %s358_s30, %s354_s2  ;;  %s360_s7 = spop %359 }
 0x311   :  { %s249_s14 = sadd.f32 %s360_s7, %s356_s3 }
 0x313   :  { %s362_s8 = spop %361 }
 0x314   :  { %s285_s11 = sadd.f32 %s362_s8, %s237_s6 }
 0x316   :  { %v298_v31 = vstv %s285_s11 }
 0x317   :  { %s364_s15 = spop %363  ;;  %299 = vst [vmem:[#allocation2] sm:$0xff] %v298_v31 }
 0x318   :  { %s297_s16 = sadd.f32 %s364_s15, %s249_s14 }
 0x319   :  { %386 = shalt.err (!%p383_p4)
}
 0x31a   :  { %s387_s20 = scalar_lea.hbm %s568_s4, 128 }
 0x31b   :  { %p388_p5 = scmp.ne.s32.totalorder %s568_s4, %s387_s20  ;;  %p391_p6 = scmp.lt.u32.totalorder %s387_s20, %s568_s4 }
 0x31d   :  { %p393_p7 = pnand %p391_p6, %p388_p5 }
 0x31f   :  { %396 = shalt.err (!%p393_p7)
}
 0x320   :  { %311 = dma.vmem_to_hbm [thread:$0]  %s309_s10, 128, %s568_s4, [#allocation3]   ;;  %v300_v32 = vstv %s297_s16 }
 0x321   :  { %301 = vst [vmem:[#allocation4] sm:$0xff] %v300_v32  ;;  %s397_s27 = scalar_lea.vmem %s319_s13, 128  ;;  %p402_p9 = scmp.lt.s32.totalorder %s319_s13, %s319_s13 }
 0x322   :  { %p398_p8 = scmp.ne.s32.totalorder %s319_s13, %s397_s27  ;;  %p403_p10 = scmp.lt.s32.totalorder %s397_s27, %s397_s27 }
 0x324   :  { %p404_p11 = por %p403_p10, %p402_p9 }
 0x326   :  { %p405_p12 = pnand %p404_p11, %p398_p8 }
 0x328   :  { %408 = shalt.err (!%p405_p12)
}
 0x329   :  { %s409_s0 = scalar_lea.hbm %s569_s5, 128 }
 0x32a   :  { %p410_p13 = scmp.ne.s32.totalorder %s569_s5, %s409_s0  ;;  %p413_p0 = scmp.lt.u32.totalorder %s409_s0, %s569_s5 }
 0x32c   :  { %p415_p1 = pnand %p413_p0, %p410_p13 }
 0x32e   :  { %418 = shalt.err (!%p415_p1)
}
 0x32f   :  { %321 = dma.vmem_to_hbm [thread:$0]  %s319_s13, 128, %s569_s5, [#allocation5]  }
 0x330   :  { %419 = dma.done.wait [#allocation3], 128  }
 0x331   :  { %420 = vsyncadd [#allocation3], 4294967168 }
 0x332   :  { %421 = dma.done.wait [#allocation5], 128  }
 0x333   :  { %422 = vsyncadd [#allocation5], 4294967168 }
 0x334   :  { %328 = vsyncpa [#allocation3], 1 }
 0x335   :  { %329 = vsyncpa [#allocation5], 1 }

</bundles_post_ra>
